<compile_context>
chip_gen: v6e
topology: v6e:2x2x1
jax: 0.10.0
libtpu: 0.0.40
codegen_flags: <defaults>
</compile_context>

<pallas_src>
import functools
import math

import jax
import jax.numpy as jnp
from jax import lax
from jax.experimental import pallas as pl
from jax.experimental.pallas import tpu as pltpu


# ----------------------------------------------------------------------------
# Helpers
# ----------------------------------------------------------------------------
_VMEM_LIMIT = 32 * 1024 * 1024  # safe on v5e/v6e/v7x; raises v5e's 16 MiB default


def _pick_tile(n, target):
    """Use a large lane/MXU-friendly tile when it divides n, else the full dim."""
    return target if n % target == 0 else n


# ----------------------------------------------------------------------------
# Kernel 1: tiled matmul with fused bias / activation / residual epilogue
# ----------------------------------------------------------------------------
def _linear_kernel(*refs, activation, has_residual):
    if has_residual:
        x_ref, w_ref, b_ref, res_ref, o_ref, acc_ref = refs
    else:
        x_ref, w_ref, b_ref, o_ref, acc_ref = refs
        res_ref = None

    k = pl.program_id(2)

    @pl.when(k == 0)
    def _():
        acc_ref[...] = jnp.zeros_like(acc_ref)

    acc_ref[...] += jnp.dot(x_ref[...], w_ref[...],
                            preferred_element_type=jnp.float32)

    @pl.when(k == pl.num_programs(2) - 1)
    def _():
        y = acc_ref[...] + b_ref[...].astype(jnp.float32)
        if activation == "relu":
            y = jnp.maximum(y, 0.0)
        if res_ref is not None:
            y = y + res_ref[...].astype(jnp.float32)
        o_ref[...] = y.astype(o_ref.dtype)


def linear(x, w, b, *, activation=None, residual=None):
    """x: (M, K), w: (K, N), b: (N,). Optional fused residual (M, N)."""
    M, K = x.shape
    K2, N = w.shape
    assert K == K2
    tm = _pick_tile(M, 256)
    tn = _pick_tile(N, 256)
    tk = _pick_tile(K, 512)
    b2 = b.reshape(1, N)

    in_specs = [
        pl.BlockSpec((tm, tk), lambda i, j, k: (i, k)),
        pl.BlockSpec((tk, tn), lambda i, j, k: (k, j)),
        pl.BlockSpec((1, tn), lambda i, j, k: (0, j)),
    ]
    args = [x, w, b2]
    if residual is not None:
        in_specs.append(pl.BlockSpec((tm, tn), lambda i, j, k: (i, j)))
        args.append(residual)

    kernel = functools.partial(_linear_kernel, activation=activation,
                               has_residual=residual is not None)
    return pl.pallas_call(
        kernel,
        out_shape=jax.ShapeDtypeStruct((M, N), x.dtype),
        grid_spec=pltpu.PrefetchScalarGridSpec(
            num_scalar_prefetch=0,
            grid=(M // tm, N // tn, K // tk),
            in_specs=in_specs,
            out_specs=pl.BlockSpec((tm, tn), lambda i, j, k: (i, j)),
            scratch_shapes=[pltpu.VMEM((tm, tn), jnp.float32)],
        ),
        compiler_params=pltpu.CompilerParams(
            dimension_semantics=("parallel", "parallel", "arbitrary"),
            vmem_limit_bytes=_VMEM_LIMIT,
        ),
    )(*args)


# ----------------------------------------------------------------------------
# Kernel 2: fused scaled-dot-product attention (one (batch, head) per step)
# ----------------------------------------------------------------------------
def _attention_kernel(q_ref, k_ref, v_ref, m_ref, o_ref, *, scale):
    q = q_ref[0, 0].astype(jnp.float32)          # (Sq, Dk)
    k = k_ref[0, 0].astype(jnp.float32)          # (Sk, Dk)
    v = v_ref[0, 0].astype(jnp.float32)          # (Sk, Dk)
    msk = m_ref[0]                               # (Sq, Sk) int32

    s = lax.dot_general(q, k, (((1,), (1,)), ((), ())),
                        preferred_element_type=jnp.float32) * scale
    s = jnp.where(msk != 0, s, jnp.float32(-1e9))
    s = s - jnp.max(s, axis=-1, keepdims=True)
    p = jnp.exp(s)
    denom = jnp.sum(p, axis=-1, keepdims=True)
    ctx = jnp.dot(p, v, preferred_element_type=jnp.float32) / denom
    o_ref[0, 0] = ctx.astype(o_ref.dtype)


def attention(q, k, v, mask):
    """q: (B,H,Sq,Dk), k/v: (B,H,Sk,Dk), mask: (B,Sq,Sk) int32 (1=keep)."""
    B, H, Sq, Dk = q.shape
    Sk = k.shape[2]
    scale = 1.0 / math.sqrt(Dk)
    kernel = functools.partial(_attention_kernel, scale=scale)
    return pl.pallas_call(
        kernel,
        out_shape=jax.ShapeDtypeStruct((B, H, Sq, Dk), q.dtype),
        grid_spec=pltpu.PrefetchScalarGridSpec(
            num_scalar_prefetch=0,
            grid=(B, H),
            in_specs=[
                pl.BlockSpec((1, 1, Sq, Dk), lambda b, h: (b, h, 0, 0)),
                pl.BlockSpec((1, 1, Sk, Dk), lambda b, h: (b, h, 0, 0)),
                pl.BlockSpec((1, 1, Sk, Dk), lambda b, h: (b, h, 0, 0)),
                pl.BlockSpec((1, Sq, Sk), lambda b, h: (b, 0, 0)),
            ],
            out_specs=pl.BlockSpec((1, 1, Sq, Dk), lambda b, h: (b, h, 0, 0)),
        ),
        compiler_params=pltpu.CompilerParams(
            dimension_semantics=("parallel", "parallel"),
            vmem_limit_bytes=_VMEM_LIMIT,
        ),
    )(q, k, v, mask)


# ----------------------------------------------------------------------------
# Kernel 3: LayerNorm over the last dim
# ----------------------------------------------------------------------------
def _layernorm_kernel(x_ref, g_ref, b_ref, o_ref, *, eps):
    x = x_ref[...].astype(jnp.float32)                      # (T, D)
    mu = jnp.mean(x, axis=-1, keepdims=True)
    xc = x - mu
    var = jnp.mean(xc * xc, axis=-1, keepdims=True)
    y = xc * lax.rsqrt(var + eps)
    o_ref[...] = (y * g_ref[...] + b_ref[...]).astype(o_ref.dtype)


def layernorm(x2d, gamma, beta, *, eps=1e-6):
    """x2d: (M, D); gamma/beta: (1, D)."""
    M, D = x2d.shape
    tm = _pick_tile(M, 512)
    kernel = functools.partial(_layernorm_kernel, eps=eps)
    return pl.pallas_call(
        kernel,
        out_shape=jax.ShapeDtypeStruct((M, D), x2d.dtype),
        grid_spec=pltpu.PrefetchScalarGridSpec(
            num_scalar_prefetch=0,
            grid=(M // tm,),
            in_specs=[
                pl.BlockSpec((tm, D), lambda i: (i, 0)),
                pl.BlockSpec((1, D), lambda i: (0, 0)),
                pl.BlockSpec((1, D), lambda i: (0, 0)),
            ],
            out_specs=pl.BlockSpec((tm, D), lambda i: (i, 0)),
        ),
        compiler_params=pltpu.CompilerParams(
            dimension_semantics=("parallel",),
            vmem_limit_bytes=_VMEM_LIMIT,
        ),
    )(x2d, gamma, beta)


# ----------------------------------------------------------------------------
# Decoder forward (wrappers around the kernels)
# ----------------------------------------------------------------------------
def multi_head_attention(p, x_q, x_kv, mask, n_heads, residual):
    B, Sq, D = x_q.shape
    Sk = x_kv.shape[1]
    dk = D // n_heads
    q = linear(x_q.reshape(B * Sq, D), p["wq"], p["bq"])
    k = linear(x_kv.reshape(B * Sk, D), p["wk"], p["bk"])
    v = linear(x_kv.reshape(B * Sk, D), p["wv"], p["bv"])
    q = q.reshape(B, Sq, n_heads, dk).transpose(0, 2, 1, 3)
    k = k.reshape(B, Sk, n_heads, dk).transpose(0, 2, 1, 3)
    v = v.reshape(B, Sk, n_heads, dk).transpose(0, 2, 1, 3)
    ctx = attention(q, k, v, mask)
    ctx = ctx.transpose(0, 2, 1, 3).reshape(B * Sq, D)
    out = linear(ctx, p["wo"], p["bo"], residual=residual.reshape(B * Sq, D))
    return out.reshape(B, Sq, D)


def decoder_layer(p, src, tgt, src_mask, tgt_mask, n_heads):
    B, St, D = tgt.shape
    # Self-attention sublayer (pre-norm; residual fused into the Wo matmul).
    y = layernorm(tgt.reshape(B * St, D), p["ln1_g"], p["ln1_b"]).reshape(B, St, D)
    tgt = multi_head_attention(p["self_attn"], y, y, tgt_mask, n_heads, residual=tgt)
    # Cross-attention sublayer over the encoder memory `src`.
    y = layernorm(tgt.reshape(B * St, D), p["ln2_g"], p["ln2_b"]).reshape(B, St, D)
    tgt = multi_head_attention(p["src_attn"], y, src, src_mask, n_heads, residual=tgt)
    # Feed-forward sublayer (ReLU fused in the first matmul, residual in the second).
    tgt2d = tgt.reshape(B * St, D)
    y = layernorm(tgt2d, p["ln3_g"], p["ln3_b"])
    h = linear(y, p["w1"], p["b1"], activation="relu")
    out = linear(h, p["w2"], p["b2"], residual=tgt2d)
    return out.reshape(B, St, D)


def decoder_forward(params, src, tgt, src_mask, tgt_mask, n_heads):
    """Mirrors Decoder.forward: apply each layer, then the final norm."""
    for lp in params["layers"]:
        tgt = decoder_layer(lp, src, tgt, src_mask, tgt_mask, n_heads)
    B, St, D = tgt.shape
    out = layernorm(tgt.reshape(B * St, D), params["norm_g"], params["norm_b"])
    return out.reshape(B, St, D)


# ----------------------------------------------------------------------------
# Pure-JAX reference (same math, for correctness check)
# ----------------------------------------------------------------------------
def _ref_layernorm(x2d, g, b, eps=1e-6):
    mu = jnp.mean(x2d, axis=-1, keepdims=True)
    xc = x2d - mu
    var = jnp.mean(xc * xc, axis=-1, keepdims=True)
    return xc * lax.rsqrt(var + eps) * g + b


def _ref_linear(x, w, b, activation=None):
    y = jnp.dot(x, w, precision=lax.Precision.HIGHEST) + b
    if activation == "relu":
        y = jnp.maximum(y, 0.0)
    return y


def _ref_mha(p, x_q, x_kv, mask, n_heads, residual):
    B, Sq, D = x_q.shape
    Sk = x_kv.shape[1]
    dk = D // n_heads
    q = _ref_linear(x_q.reshape(B * Sq, D), p["wq"], p["bq"]).reshape(
        B, Sq, n_heads, dk).transpose(0, 2, 1, 3)
    k = _ref_linear(x_kv.reshape(B * Sk, D), p["wk"], p["bk"]).reshape(
        B, Sk, n_heads, dk).transpose(0, 2, 1, 3)
    v = _ref_linear(x_kv.reshape(B * Sk, D), p["wv"], p["bv"]).reshape(
        B, Sk, n_heads, dk).transpose(0, 2, 1, 3)
    s = jnp.einsum("bhqd,bhkd->bhqk", q, k,
                   precision=lax.Precision.HIGHEST) / math.sqrt(dk)
    s = jnp.where(mask[:, None, :, :] != 0, s, -1e9)
    s = s - jnp.max(s, axis=-1, keepdims=True)
    pa = jnp.exp(s)
    pa = pa / jnp.sum(pa, axis=-1, keepdims=True)
    ctx = jnp.einsum("bhqk,bhkd->bhqd", pa, v, precision=lax.Precision.HIGHEST)
    ctx = ctx.transpose(0, 2, 1, 3).reshape(B * Sq, D)
    out = _ref_linear(ctx, p["wo"], p["bo"]) + residual.reshape(B * Sq, D)
    return out.reshape(B, Sq, D)


def _ref_layer(p, src, tgt, src_mask, tgt_mask, n_heads):
    B, St, D = tgt.shape
    y = _ref_layernorm(tgt.reshape(B * St, D), p["ln1_g"], p["ln1_b"]).reshape(B, St, D)
    tgt = _ref_mha(p["self_attn"], y, y, tgt_mask, n_heads, residual=tgt)
    y = _ref_layernorm(tgt.reshape(B * St, D), p["ln2_g"], p["ln2_b"]).reshape(B, St, D)
    tgt = _ref_mha(p["src_attn"], y, src, src_mask, n_heads, residual=tgt)
    t2 = tgt.reshape(B * St, D)
    y = _ref_layernorm(t2, p["ln3_g"], p["ln3_b"])
    h = _ref_linear(y, p["w1"], p["b1"], activation="relu")
    out = _ref_linear(h, p["w2"], p["b2"]) + t2
    return out.reshape(B, St, D)


def ref_decoder_forward(params, src, tgt, src_mask, tgt_mask, n_heads):
    for lp in params["layers"]:
        tgt = _ref_layer(lp, src, tgt, src_mask, tgt_mask, n_heads)
    B, St, D = tgt.shape
    return _ref_layernorm(tgt.reshape(B * St, D),
                          params["norm_g"], params["norm_b"]).reshape(B, St, D)


# ----------------------------------------------------------------------------
# Parameter init
# ----------------------------------------------------------------------------
def init_params(key, n_layers, d_model, n_heads, d_ff):
    def dense(k, din, dout):
        kw, kb = jax.random.split(k)
        w = jax.random.normal(kw, (din, dout), jnp.float32) / math.sqrt(din)
        b = 0.01 * jax.random.normal(kb, (dout,), jnp.float32)
        return w, b

    def ln(k, d):
        kg, kb = jax.random.split(k)
        g = 1.0 + 0.1 * jax.random.normal(kg, (1, d), jnp.float32)
        b = 0.1 * jax.random.normal(kb, (1, d), jnp.float32)
        return g, b

    def attn_params(k):
        ks = jax.random.split(k, 4)
        p = {}
        for name, kk in zip(("q", "k", "v", "o"), ks):
            w, b = dense(kk, d_model, d_model)
            p["w" + name] = w
            p["b" + name] = b
        return p

    keys = jax.random.split(key, n_layers + 1)
    layers = []
    for i in range(n_layers):
        ks = jax.random.split(keys[i], 7)
        self_attn = attn_params(ks[0])
        src_attn = attn_params(ks[1])
        w1, b1 = dense(ks[2], d_model, d_ff)
        w2, b2 = dense(ks[3], d_ff, d_model)
        ln1_g, ln1_b = ln(ks[4], d_model)
        ln2_g, ln2_b = ln(ks[5], d_model)
        ln3_g, ln3_b = ln(ks[6], d_model)
        layers.append(dict(self_attn=self_attn, src_attn=src_attn,
                           w1=w1, b1=b1, w2=w2, b2=b2,
                           ln1_g=ln1_g, ln1_b=ln1_b,
                           ln2_g=ln2_g, ln2_b=ln2_b,
                           ln3_g=ln3_g, ln3_b=ln3_b))
    kg, kb = jax.random.split(keys[-1])
    norm_g = 1.0 + 0.1 * jax.random.normal(kg, (1, d_model), jnp.float32)
    norm_b = 0.1 * jax.random.normal(kb, (1, d_model), jnp.float32)
    return dict(layers=layers, norm_g=norm_g, norm_b=norm_b)


# ----------------------------------------------------------------------------
# Demo / correctness check
# ----------------------------------------------------------------------------
if __name__ == "__main__":
    B, S_src, S_tgt = 2, 8, 8
    d_model, n_heads, d_ff, n_layers = 32, 4, 64, 2

    root = jax.random.PRNGKey(0)
    k_params, k_src, k_tgt = jax.random.split(root, 3)

    params = init_params(k_params, n_layers, d_model, n_heads, d_ff)
    src = jax.random.normal(k_src, (B, S_src, d_model), jnp.float32)
    tgt = jax.random.normal(k_tgt, (B, S_tgt, d_model), jnp.float32)

    # Causal mask for the target self-attention; padding mask for the source.
    tgt_mask = jnp.tile(jnp.tril(jnp.ones((S_tgt, S_tgt), jnp.int32))[None],
                        (B, 1, 1))                                    # (B, St, St)
    src_valid = jnp.array([[1] * S_src,
                           [1] * (S_src - 2) + [0, 0]], jnp.int32)    # (B, Ss)
    src_mask = jnp.tile(src_valid[:, None, :], (1, S_tgt, 1))         # (B, St, Ss)

    out = decoder_forward(params, src, tgt, src_mask, tgt_mask, n_heads)
    out = jax.block_until_ready(out)

    ref = ref_decoder_forward(params, src, tgt, src_mask, tgt_mask, n_heads)
    assert out.shape == (B, S_tgt, d_model)
    max_err = float(jnp.max(jnp.abs(out - ref)))
    assert jnp.allclose(out, ref, atol=1e-3, rtol=1e-3), f"max abs err {max_err}"

    print("KERNEL_OK")
</pallas_src>

<mosaic_0001>
module attributes {stable_mosaic.version = 11 : i64} {
  func.func @_layernorm_kernel(%arg0: i32, %arg1: memref<16x32xf32, #tpu.memory_space<vmem>>, %arg2: memref<1x32xf32, #tpu.memory_space<vmem>>, %arg3: memref<1x32xf32, #tpu.memory_space<vmem>>, %arg4: memref<16x32xf32, #tpu.memory_space<vmem>>) attributes {dimension_semantics = [#tpu.dimension_semantics<parallel>], iteration_bounds = array<i64: 1>, scalar_prefetch = 0 : i64, scratch_operands = 0 : i64, tpu.core_type = #tpu.core_type<tc>, window_params = [{transform_indices = @transform_0, window_bounds = array<i64: 16, 32>}, {pipeline_mode = #tpu.pipeline_mode<synchronous>, transform_indices = @transform_1, window_bounds = array<i64: 1, 32>}, {pipeline_mode = #tpu.pipeline_mode<synchronous>, transform_indices = @transform_2, window_bounds = array<i64: 1, 32>}, {transform_indices = @transform_3, window_bounds = array<i64: 16, 32>}]} {
    %c0 = arith.constant 0 : index
    %c0_0 = arith.constant 0 : index
    %0 = vector.load %arg1[%c0, %c0_0] : memref<16x32xf32, #tpu.memory_space<vmem>>, vector<16x32xf32>
    %cst = arith.constant dense<0.000000e+00> : vector<16xf32>
    %1 = vector.multi_reduction <add>, %0, %cst [1] : vector<16x32xf32> to vector<16xf32>
    %2 = vector.shape_cast %1 : vector<16xf32> to vector<16x1xf32>
    %cst_1 = arith.constant 3.200000e+01 : f32
    %3 = vector.broadcast %cst_1 : f32 to vector<16x1xf32>
    %4 = arith.divf %2, %3 : vector<16x1xf32>
    %5 = vector.broadcast %4 : vector<16x1xf32> to vector<16x32xf32>
    %6 = arith.subf %0, %5 : vector<16x32xf32>
    %7 = arith.mulf %6, %6 : vector<16x32xf32>
    %cst_2 = arith.constant dense<0.000000e+00> : vector<16xf32>
    %8 = vector.multi_reduction <add>, %7, %cst_2 [1] : vector<16x32xf32> to vector<16xf32>
    %9 = vector.shape_cast %8 : vector<16xf32> to vector<16x1xf32>
    %cst_3 = arith.constant 3.200000e+01 : f32
    %10 = vector.broadcast %cst_3 : f32 to vector<16x1xf32>
    %11 = arith.divf %9, %10 : vector<16x1xf32>
    %cst_4 = arith.constant 9.99999997E-7 : f32
    %12 = vector.broadcast %cst_4 : f32 to vector<16x1xf32>
    %13 = arith.addf %11, %12 : vector<16x1xf32>
    %14 = math.rsqrt %13 : vector<16x1xf32>
    %15 = vector.broadcast %14 : vector<16x1xf32> to vector<16x32xf32>
    %16 = arith.mulf %6, %15 : vector<16x32xf32>
    %c0_5 = arith.constant 0 : index
    %c0_6 = arith.constant 0 : index
    %17 = vector.load %arg2[%c0_5, %c0_6] : memref<1x32xf32, #tpu.memory_space<vmem>>, vector<1x32xf32>
    %18 = vector.broadcast %17 : vector<1x32xf32> to vector<16x32xf32>
    %19 = arith.mulf %16, %18 : vector<16x32xf32>
    %c0_7 = arith.constant 0 : index
    %c0_8 = arith.constant 0 : index
    %20 = vector.load %arg3[%c0_7, %c0_8] : memref<1x32xf32, #tpu.memory_space<vmem>>, vector<1x32xf32>
    %21 = vector.broadcast %20 : vector<1x32xf32> to vector<16x32xf32>
    %22 = arith.addf %19, %21 : vector<16x32xf32>
    %c0_9 = arith.constant 0 : index
    %c0_10 = arith.constant 0 : index
    %23 = vector.load %arg4[%c0_9, %c0_10] : memref<16x32xf32, #tpu.memory_space<vmem>>, vector<16x32xf32>
    tpu.vector_store %arg4[%c0_9, %c0_10], %22 {strides = array<i32>} : memref<16x32xf32, #tpu.memory_space<vmem>>, vector<16x32xf32>,
    return
  }
  func.func @transform_0(%arg0: i32) -> (i32, i32) {
    %c0_i32 = arith.constant 0 : i32
    %c0_i32_0 = arith.constant 0 : i32
    return %arg0, %c0_i32 : i32, i32
  }
  func.func @transform_1(%arg0: i32) -> (i32, i32) {
    %c0_i32 = arith.constant 0 : i32
    %c0_i32_0 = arith.constant 0 : i32
    %c0_i32_1 = arith.constant 0 : i32
    return %c0_i32, %c0_i32_0 : i32, i32
  }
  func.func @transform_2(%arg0: i32) -> (i32, i32) {
    %c0_i32 = arith.constant 0 : i32
    %c0_i32_0 = arith.constant 0 : i32
    %c0_i32_1 = arith.constant 0 : i32
    return %c0_i32, %c0_i32_0 : i32, i32
  }
  func.func @transform_3(%arg0: i32) -> (i32, i32) {
    %c0_i32 = arith.constant 0 : i32
    %c0_i32_0 = arith.constant 0 : i32
    return %arg0, %c0_i32 : i32, i32
  }
}

</mosaic_0001>

<bundles_post_ra>
// kernel: tpu_custom_call.1
= control target key start
LH: loop header
LB: loop body
LE: loop exit
PB: predicated region body
PF: predicated region fallthrough
CT: control target
= control target key end

     0   :  { %8 = vsyncpa [#allocation3], 0  ;;  %s198_s0 = inlined_call_operand.hbm [shape: f32[16,32], index: 0, kind: input, shape index: {}]   ;;  %s199_s1 = inlined_call_operand.vmem [shape: f32[1,32], index: 1, kind: input, shape index: {}]   ;;  %s200_s2 = inlined_call_operand.vmem [shape: f32[1,32], index: 2, kind: input, shape index: {}]   ;;  %s201_s3 = inlined_call_operand.hbm [shape: f32[16,32], index: 3, kind: output, shape index: {}]  }
   0x1   :  { %9 = vsyncpa [#allocation4], 0  ;;  %s150_s12 = smov [#allocation2]  }
   0x2   :  { %s15_s13 = sshll.u32 %s150_s12, 4  ;;  %s16_s13 = int_to_ptr.vmem [resolvable:$true] %s15_s13 }
   0x3   :  { %s114_s14 = scalar_lea.vmem %s16_s13, 256  ;;  %p119_p1 = scmp.lt.s32.totalorder %s16_s13, %s16_s13 }
   0x4   :  { %p115_p0 = scmp.ne.s32.totalorder %s16_s13, %s114_s14  ;;  %p120_p2 = scmp.lt.s32.totalorder %s114_s14, %s114_s14 }
   0x6   :  { %p121_p3 = por %p120_p2, %p119_p1 }
   0x8   :  { %p122_p4 = pnand %p121_p3, %p115_p0 }
   0xa   :  { %125 = shalt.err (!%p122_p4)
}
   0xb   :  { %s151_s15 = smov 128   ;;  %s152_s16 = smov 8  }
   0xc   :  { %21 = dma.hbm_to_vmem [thread:$0]  %s198_s0, 256, %s16_s13, [#allocation3], %s151_s15, %s151_s15, %s152_s16  }
   0xd   :  { %146 = dma.done.wait [#allocation3], 256  }
   0xe   :  { %147 = vsyncadd [#allocation3], 4294967040  ;;  %vm31_vm0 = vcmask 261120   ;;  %v29_v0 = vld [vmem:[#allocation2] sm:$0xff]  ;;  %v30_v1 = vld [vmem:[#allocation2 + $0x8] sm:$0xff]  ;;  %s153_s22 = smov [#allocation5]  }
   0xf   :  { %v32_v2 = vsel %vm31_vm0, %v29_v0, 0.0  ;;  %v35_v3 = vsel %vm31_vm0, %v30_v1, 0.0  ;;  %v96_v21 = vld [vmem:[%s199_s1] ss:$0 sm:$0xff]  ;;  %s84_s23 = sshll.u32 %s153_s22, 4  ;;  %s85_s23 = int_to_ptr.vmem [resolvable:$true] %s84_s23 }
  0x10   :  { %33 = vadd.xlane.f32.xlu0 %v32_v2  ;;  %v97_v23 = vld [vmem:[%s200_s2] ss:$0 sm:$0xff]  ;;  %s126_s24 = scalar_lea.vmem %s85_s23, 256  ;;  %p131_p6 = scmp.lt.s32.totalorder %s85_s23, %s85_s23 }
  0x11   :  { %p127_p5 = scmp.ne.s32.totalorder %s85_s23, %s126_s24  ;;  %p132_p7 = scmp.lt.s32.totalorder %s126_s24, %s126_s24 }
  0x13   :  { %p133_p8 = por %p132_p7, %p131_p6 }
  0x14   :  { %36 = vadd.xlane.f32.xlu0 %v35_v3 }
  0x15   :  { %p134_p9 = pnand %p133_p8, %p127_p5 }
  0x99   :  { %v34_v4 = vpop.xlane.xlu0 %33 }
  0x9a   :  { %v39_v5 = vmul.f32 0.03125, %v34_v4 }
  0x9c   :  { %v41_v6 = vsub.f32 %v29_v0, %v39_v5 }
  0x9d   :  { %v37_v7 = vpop.xlane.xlu0 %36 }
  0x9e   :  { %v40_v8 = vmul.f32 0.03125, %v37_v7  ;;  %v43_v9 = vmul.f32 %v41_v6, %v41_v6 }
  0xa0   :  { %v42_v10 = vsub.f32 %v30_v1, %v40_v8  ;;  %v45_v11 = vsel %vm31_vm0, %v43_v9, 0.0 }
  0xa1   :  { %46 = vadd.xlane.f32.xlu1 %v45_v11 }
  0xa2   :  { %v44_v12 = vmul.f32 %v42_v10, %v42_v10 }
  0xa4   :  { %v48_v13 = vsel %vm31_vm0, %v44_v12, 0.0 }
  0xa5   :  { %49 = vadd.xlane.f32.xlu1 %v48_v13 }
 0x12a   :  { %v47_v14 = vpop.xlane.xlu1 %46 }
 0x12b   :  { %v51_v15 = vmul.f32 0.03125, %v47_v14 }
 0x12d   :  { %v53_v16 = vadd.f32 1e-06, %v51_v15 }
 0x12e   :  { %v50_v17 = vpop.xlane.xlu1 %49 }
 0x12f   :  { %102 = vrsqrt.f32 %v53_v16  ;;  %v52_v18 = vmul.f32 0.03125, %v50_v17 }
 0x131   :  { %v54_v19 = vadd.f32 1e-06, %v52_v18 }
 0x133   :  { %104 = vrsqrt.f32 %v54_v19 }
 0x13c   :  { %v103_v20 = vpop.eup %102 }
 0x13d   :  { %v57_v22 = vmul.f32 %v103_v20, %v41_v6 }
 0x13f   :  { %v66_v24 = vmul.f32 %v96_v21, %v57_v22 }
 0x140   :  { %v105_v25 = vpop.eup %104 }
 0x141   :  { %v58_v26 = vmul.f32 %v105_v25, %v42_v10  ;;  %v75_v27 = vadd.f32 %v97_v23, %v66_v24 }
 0x143   :  { %v67_v28 = vmul.f32 %v96_v21, %v58_v26  ;;  %77 = vst.msk [vmem:[#allocation5] sm:$0xff] %vm31_vm0, %v75_v27 }
 0x145   :  { %v76_v29 = vadd.f32 %v97_v23, %v67_v28 }
 0x147   :  { %78 = vst.msk [vmem:[#allocation5 + $0x8] sm:$0xff] %vm31_vm0, %v76_v29 }
 0x148   :  { %137 = shalt.err (!%p134_p9)
}
 0x149   :  { %90 = dma.vmem_to_hbm [thread:$0]  %s85_s23, 256, %s201_s3, [#allocation4], %s151_s15, %s151_s15, %s152_s16  }
 0x14a   :  { %148 = dma.done.wait [#allocation4], 256  }
 0x14b   :  { %149 = vsyncadd [#allocation4], 4294967040 }
 0x14c   :  { %94 = vsyncpa [#allocation3], 1 }
 0x14d   :  { %95 = vsyncpa [#allocation4], 1 }

</bundles_post_ra>
